<compile_context>
chip_gen: v6e
topology: v6e:2x2x1
jax: 0.10.0
libtpu: 0.0.40
codegen_flags: <defaults>
</compile_context>

<pallas_src>
import functools

import jax
import jax.numpy as jnp
from jax import lax
from jax.experimental import pallas as pl
from jax.experimental.pallas import tpu as pltpu

_IN_EPS = 1e-3   # InstanceNorm2d(eps=0.001) from the module
_BN_EPS = 1e-5   # BatchNorm2d default eps


def _instnorm_stats_kernel(x_ref, h_ref, sum_ref, ssq_ref):
    """Per-batch InstanceNorm + partial sums for the BatchNorm batch statistics."""
    x = x_ref[0].astype(jnp.float32)                        # (C, N)
    inv_n = 1.0 / x.shape[1]
    mu = jnp.sum(x, axis=1, keepdims=True) * inv_n          # (C, 1)
    xc = x - mu
    var = jnp.sum(xc * xc, axis=1, keepdims=True) * inv_n   # biased var (C, 1)
    h1 = xc * lax.rsqrt(var + _IN_EPS)                      # (C, N)
    h_ref[0] = h1.astype(h_ref.dtype)
    # Partial sums per channel for the cross-batch BatchNorm statistics.
    sum_ref[0] = jnp.sum(h1, axis=1, keepdims=True)         # (C, 1)
    ssq_ref[0] = jnp.sum(h1 * h1, axis=1, keepdims=True)    # (C, 1)


def _unpool_kernel(h_ref, sum_ref, ssq_ref, gamma_ref, beta_ref, w_ref, bias_ref,
                   xd_ref, o_ref):
    """BatchNorm + ReLU + 1x1 conv + softmax(over P) + (D,P)@(P,N) matmul, per batch."""
    h1 = h_ref[0].astype(jnp.float32)                       # (C, N)
    sums = sum_ref[...].astype(jnp.float32)                 # (B, C, 1)
    ssqs = ssq_ref[...].astype(jnp.float32)                 # (B, C, 1)

    count = float(sums.shape[0] * h1.shape[1])              # B * N (static)
    mean = jnp.sum(sums, axis=0) * (1.0 / count)            # (C, 1)
    ex2 = jnp.sum(ssqs, axis=0) * (1.0 / count)             # (C, 1)
    var = jnp.maximum(ex2 - mean * mean, 0.0)               # biased batch var

    scale = gamma_ref[...].astype(jnp.float32) * lax.rsqrt(var + _BN_EPS)   # (C, 1)
    shift = beta_ref[...].astype(jnp.float32) - scale * mean                # (C, 1)

    h2 = jnp.maximum(h1 * scale + shift, 0.0)               # BN(+affine)+ReLU, (C, N)

    # 1x1 conv == channel matmul on the MXU.
    embed = jnp.dot(w_ref[...].astype(jnp.float32), h2,
                    preferred_element_type=jnp.float32)     # (P, N)
    embed = embed + bias_ref[...].astype(jnp.float32)       # + bias (P, 1)

    # softmax over the P axis (dim=1 of the NCHW tensor).
    m = jnp.max(embed, axis=0, keepdims=True)               # (1, N)
    e = jnp.exp(embed - m)
    s_mat = e / jnp.sum(e, axis=0, keepdims=True)           # (P, N)

    xd = xd_ref[0].astype(jnp.float32)                      # (D, P)
    out = jnp.dot(xd, s_mat, preferred_element_type=jnp.float32)   # (D, N)
    o_ref[0] = out.astype(o_ref.dtype)


@jax.jit
def diff_unpool_forward(x_up, x_down, bn_gamma, bn_beta, conv_w, conv_b):
    """Pallas implementation of diff_unpool.forward(x_up, x_down)."""
    B, C, N, W = x_up.shape
    Bd, D, P, Wd = x_down.shape
    assert W == 1 and Wd == 1 and Bd == B, (x_up.shape, x_down.shape)
    assert conv_w.shape[0] == P and conv_w.shape[1] == C

    out_dtype = x_up.dtype

    # Degenerate shapes: skip Pallas entirely (launch cost / zero-extent blocks).
    if B == 0 or C == 0 or N == 0 or D == 0 or P == 0:
        return jnp.zeros((B, D, N, 1), dtype=out_dtype)

    # squeeze(3) is metadata-only: drop the trailing size-1 spatial dim for free.
    xu = x_up.reshape(B, C, N)
    xd = x_down.reshape(B, D, P)
    w2 = conv_w.reshape(P, C)
    b2 = conv_b.reshape(P, 1)
    g2 = bn_gamma.reshape(C, 1)
    be2 = bn_beta.reshape(C, 1)

    cparams = pltpu.CompilerParams(
        dimension_semantics=("parallel",),          # shard batch over TCs on v7x
        vmem_limit_bytes=32 * 1024 * 1024,          # safe on v5e/v6e/v7x scoped VMEM
    )

    # Pass 1: InstanceNorm per (b, c) + per-batch partial sums for BatchNorm.
    h1, psum, pssq = pl.pallas_call(
        _instnorm_stats_kernel,
        grid=(B,),
        in_specs=[pl.BlockSpec((1, C, N), lambda b: (b, 0, 0))],
        out_specs=(
            pl.BlockSpec((1, C, N), lambda b: (b, 0, 0)),
            pl.BlockSpec((1, C, 1), lambda b: (b, 0, 0)),
            pl.BlockSpec((1, C, 1), lambda b: (b, 0, 0)),
        ),
        out_shape=(
            jax.ShapeDtypeStruct((B, C, N), jnp.float32),
            jax.ShapeDtypeStruct((B, C, 1), jnp.float32),
            jax.ShapeDtypeStruct((B, C, 1), jnp.float32),
        ),
        compiler_params=cparams,
    )(xu)

    # Pass 2: BatchNorm + ReLU + 1x1 conv + softmax(P) + (D,P)@(P,N), per batch.
    out3 = pl.pallas_call(
        _unpool_kernel,
        grid=(B,),
        in_specs=[
            pl.BlockSpec((1, C, N), lambda b: (b, 0, 0)),   # h1 tile for this batch
            pl.BlockSpec((B, C, 1), lambda b: (0, 0, 0)),   # all partial sums (tiny)
            pl.BlockSpec((B, C, 1), lambda b: (0, 0, 0)),   # all partial sumsq (tiny)
            pl.BlockSpec((C, 1), lambda b: (0, 0)),         # BN gamma
            pl.BlockSpec((C, 1), lambda b: (0, 0)),         # BN beta
            pl.BlockSpec((P, C), lambda b: (0, 0)),         # 1x1 conv weight
            pl.BlockSpec((P, 1), lambda b: (0, 0)),         # conv bias
            pl.BlockSpec((1, D, P), lambda b: (b, 0, 0)),   # x_down tile
        ],
        out_specs=pl.BlockSpec((1, D, N), lambda b: (b, 0, 0)),
        out_shape=jax.ShapeDtypeStruct((B, D, N), out_dtype),
        compiler_params=cparams,
    )(h1, psum, pssq, g2, be2, w2, b2, xd)

    # torch's trailing .unsqueeze(3) is metadata-only: free reshape, no copy kernel.
    return out3.reshape(B, D, N, 1)


def _reference_forward(x_up, x_down, bn_gamma, bn_beta, conv_w, conv_b):
    """Pure-JAX reference matching the PyTorch module (training-mode BatchNorm)."""
    mu = jnp.mean(x_up, axis=(2, 3), keepdims=True)
    var = jnp.var(x_up, axis=(2, 3), keepdims=True)
    h1 = (x_up - mu) / jnp.sqrt(var + _IN_EPS)
    bmu = jnp.mean(h1, axis=(0, 2, 3), keepdims=True)
    bvar = jnp.var(h1, axis=(0, 2, 3), keepdims=True)
    h2 = bn_gamma.reshape(1, -1, 1, 1) * (h1 - bmu) / jnp.sqrt(bvar + _BN_EPS) \
         + bn_beta.reshape(1, -1, 1, 1)
    h2 = jnp.maximum(h2, 0.0)
    P = conv_w.shape[0]
    embed = jnp.einsum('pc,bcnw->bpnw', conv_w.reshape(P, -1), h2) \
            + conv_b.reshape(1, -1, 1, 1)
    S = jax.nn.softmax(embed, axis=1)[..., 0]                  # (B, P, N)
    out = jnp.einsum('bdp,bpn->bdn', x_down[..., 0], S)        # (B, D, N)
    return out[..., None]


if __name__ == "__main__":
    key = jax.random.PRNGKey(0)
    kx, kd, kw, kb = jax.random.split(key, 4)

    B, C, N, P, D = 2, 4, 16, 8, 32        # batch, in_channel, points, output_points, down-channels
    x_up = jax.random.normal(kx, (B, C, N, 1), dtype=jnp.float32)
    x_down = jax.random.normal(kd, (B, D, P, 1), dtype=jnp.float32)
    bn_gamma = jnp.ones((C,), jnp.float32)     # BatchNorm2d default affine init
    bn_beta = jnp.zeros((C,), jnp.float32)
    conv_w = jax.random.normal(kw, (P, C, 1, 1), dtype=jnp.float32) * 0.5
    conv_b = jax.random.normal(kb, (P,), dtype=jnp.float32) * 0.1

    out = diff_unpool_forward(x_up, x_down, bn_gamma, bn_beta, conv_w, conv_b)
    jax.block_until_ready(out)

    ref = _reference_forward(x_up, x_down, bn_gamma, bn_beta, conv_w, conv_b)
    assert out.shape == (B, D, N, 1), out.shape
    assert out.dtype == x_up.dtype
    assert jnp.allclose(out, ref, atol=1e-4, rtol=1e-4), float(jnp.max(jnp.abs(out - ref)))

    print("KERNEL_OK")
</pallas_src>

<mosaic_0001>
module attributes {stable_mosaic.version = 11 : i64} {
  func.func @_instnorm_stats_kernel(%arg0: i32, %arg1: memref<1x4x16xf32, #tpu.memory_space<vmem>>, %arg2: memref<1x4x16xf32, #tpu.memory_space<vmem>>, %arg3: memref<1x4x1xf32, #tpu.memory_space<vmem>>, %arg4: memref<1x4x1xf32, #tpu.memory_space<vmem>>) attributes {dimension_semantics = [#tpu.dimension_semantics<parallel>], iteration_bounds = array<i64: 2>, scalar_prefetch = 0 : i64, scratch_operands = 0 : i64, tpu.core_type = #tpu.core_type<tc>, window_params = [{transform_indices = @transform_0, window_bounds = array<i64: 1, 4, 16>}, {transform_indices = @transform_1, window_bounds = array<i64: 1, 4, 16>}, {transform_indices = @transform_2, window_bounds = array<i64: 1, 4, 1>}, {transform_indices = @transform_3, window_bounds = array<i64: 1, 4, 1>}]} {
    %c0 = arith.constant 0 : index
    %c0_0 = arith.constant 0 : index
    %c0_1 = arith.constant 0 : index
    %0 = vector.load %arg1[%c0, %c0_0, %c0_1] : memref<1x4x16xf32, #tpu.memory_space<vmem>>, vector<1x4x16xf32>
    %1 = vector.shape_cast %0 : vector<1x4x16xf32> to vector<4x16xf32>
    %cst = arith.constant dense<0.000000e+00> : vector<4xf32>
    %2 = vector.multi_reduction <add>, %1, %cst [1] : vector<4x16xf32> to vector<4xf32>
    %3 = vector.shape_cast %2 : vector<4xf32> to vector<4x1xf32>
    %cst_2 = arith.constant 6.250000e-02 : f32
    %4 = vector.broadcast %cst_2 : f32 to vector<4x1xf32>
    %5 = arith.mulf %3, %4 : vector<4x1xf32>
    %6 = vector.broadcast %5 : vector<4x1xf32> to vector<4x16xf32>
    %7 = arith.subf %1, %6 : vector<4x16xf32>
    %8 = arith.mulf %7, %7 : vector<4x16xf32>
    %cst_3 = arith.constant dense<0.000000e+00> : vector<4xf32>
    %9 = vector.multi_reduction <add>, %8, %cst_3 [1] : vector<4x16xf32> to vector<4xf32>
    %10 = vector.shape_cast %9 : vector<4xf32> to vector<4x1xf32>
    %cst_4 = arith.constant 6.250000e-02 : f32
    %11 = vector.broadcast %cst_4 : f32 to vector<4x1xf32>
    %12 = arith.mulf %10, %11 : vector<4x1xf32>
    %cst_5 = arith.constant 1.000000e-03 : f32
    %13 = vector.broadcast %cst_5 : f32 to vector<4x1xf32>
    %14 = arith.addf %12, %13 : vector<4x1xf32>
    %15 = math.rsqrt %14 : vector<4x1xf32>
    %16 = vector.broadcast %15 : vector<4x1xf32> to vector<4x16xf32>
    %17 = arith.mulf %7, %16 : vector<4x16xf32>
    %c0_6 = arith.constant 0 : index
    %c0_7 = arith.constant 0 : index
    %c0_8 = arith.constant 0 : index
    %18 = vector.load %arg2[%c0_6, %c0_7, %c0_8] : memref<1x4x16xf32, #tpu.memory_space<vmem>>, vector<1x4x16xf32>
    %19 = vector.shape_cast %18 : vector<1x4x16xf32> to vector<4x16xf32>
    %20 = vector.shape_cast %17 : vector<4x16xf32> to vector<1x4x16xf32>
    tpu.vector_store %arg2[%c0_6, %c0_7, %c0_8], %20 {strides = array<i32>} : memref<1x4x16xf32, #tpu.memory_space<vmem>>, vector<1x4x16xf32>,
    %cst_9 = arith.constant dense<0.000000e+00> : vector<4xf32>
    %21 = vector.multi_reduction <add>, %17, %cst_9 [1] : vector<4x16xf32> to vector<4xf32>
    %22 = vector.shape_cast %21 : vector<4xf32> to vector<4x1xf32>
    %c0_10 = arith.constant 0 : index
    %c0_11 = arith.constant 0 : index
    %c0_12 = arith.constant 0 : index
    %23 = vector.load %arg3[%c0_10, %c0_11, %c0_12] : memref<1x4x1xf32, #tpu.memory_space<vmem>>, vector<1x4x1xf32>
    %24 = vector.shape_cast %23 : vector<1x4x1xf32> to vector<4x1xf32>
    %25 = vector.shape_cast %22 : vector<4x1xf32> to vector<1x4x1xf32>
    tpu.vector_store %arg3[%c0_10, %c0_11, %c0_12], %25 {strides = array<i32>} : memref<1x4x1xf32, #tpu.memory_space<vmem>>, vector<1x4x1xf32>,
    %26 = arith.mulf %17, %17 : vector<4x16xf32>
    %cst_13 = arith.constant dense<0.000000e+00> : vector<4xf32>
    %27 = vector.multi_reduction <add>, %26, %cst_13 [1] : vector<4x16xf32> to vector<4xf32>
    %28 = vector.shape_cast %27 : vector<4xf32> to vector<4x1xf32>
    %c0_14 = arith.constant 0 : index
    %c0_15 = arith.constant 0 : index
    %c0_16 = arith.constant 0 : index
    %29 = vector.load %arg4[%c0_14, %c0_15, %c0_16] : memref<1x4x1xf32, #tpu.memory_space<vmem>>, vector<1x4x1xf32>
    %30 = vector.shape_cast %29 : vector<1x4x1xf32> to vector<4x1xf32>
    %31 = vector.shape_cast %28 : vector<4x1xf32> to vector<1x4x1xf32>
    tpu.vector_store %arg4[%c0_14, %c0_15, %c0_16], %31 {strides = array<i32>} : memref<1x4x1xf32, #tpu.memory_space<vmem>>, vector<1x4x1xf32>,
    return
  }
  func.func @transform_0(%arg0: i32) -> (i32, i32, i32) {
    %c0_i32 = arith.constant 0 : i32
    %c0_i32_0 = arith.constant 0 : i32
    %c0_i32_1 = arith.constant 0 : i32
    return %arg0, %c0_i32, %c0_i32_0 : i32, i32, i32
  }
  func.func @transform_1(%arg0: i32) -> (i32, i32, i32) {
    %c0_i32 = arith.constant 0 : i32
    %c0_i32_0 = arith.constant 0 : i32
    %c0_i32_1 = arith.constant 0 : i32
    return %arg0, %c0_i32, %c0_i32_0 : i32, i32, i32
  }
  func.func @transform_2(%arg0: i32) -> (i32, i32, i32) {
    %c0_i32 = arith.constant 0 : i32
    %c0_i32_0 = arith.constant 0 : i32
    %c0_i32_1 = arith.constant 0 : i32
    return %arg0, %c0_i32, %c0_i32_0 : i32, i32, i32
  }
  func.func @transform_3(%arg0: i32) -> (i32, i32, i32) {
    %c0_i32 = arith.constant 0 : i32
    %c0_i32_0 = arith.constant 0 : i32
    %c0_i32_1 = arith.constant 0 : i32
    return %arg0, %c0_i32, %c0_i32_0 : i32, i32, i32
  }
}

module attributes {stable_mosaic.version = 11 : i64} {
  func.func @_unpool_kernel(%arg0: i32, %arg1: memref<1x4x16xf32, #tpu.memory_space<vmem>>, %arg2: memref<2x4x1xf32, #tpu.memory_space<vmem>>, %arg3: memref<2x4x1xf32, #tpu.memory_space<vmem>>, %arg4: memref<4x1xf32, #tpu.memory_space<vmem>>, %arg5: memref<4x1xf32, #tpu.memory_space<vmem>>, %arg6: memref<8x4xf32, #tpu.memory_space<vmem>>, %arg7: memref<8x1xf32, #tpu.memory_space<vmem>>, %arg8: memref<1x32x8xf32, #tpu.memory_space<vmem>>, %arg9: memref<1x32x16xf32, #tpu.memory_space<vmem>>) attributes {dimension_semantics = [#tpu.dimension_semantics<parallel>], iteration_bounds = array<i64: 2>, scalar_prefetch = 0 : i64, scratch_operands = 0 : i64, tpu.core_type = #tpu.core_type<tc>, window_params = [{transform_indices = @transform_0, window_bounds = array<i64: 1, 4, 16>}, {pipeline_mode = #tpu.pipeline_mode<synchronous>, transform_indices = @transform_1, window_bounds = array<i64: 2, 4, 1>}, {pipeline_mode = #tpu.pipeline_mode<synchronous>, transform_indices = @transform_2, window_bounds = array<i64: 2, 4, 1>}, {pipeline_mode = #tpu.pipeline_mode<synchronous>, transform_indices = @transform_3, window_bounds = array<i64: 4, 1>}, {pipeline_mode = #tpu.pipeline_mode<synchronous>, transform_indices = @transform_4, window_bounds = array<i64: 4, 1>}, {pipeline_mode = #tpu.pipeline_mode<synchronous>, transform_indices = @transform_5, window_bounds = array<i64: 8, 4>}, {pipeline_mode = #tpu.pipeline_mode<synchronous>, transform_indices = @transform_6, window_bounds = array<i64: 8, 1>}, {transform_indices = @transform_7, window_bounds = array<i64: 1, 32, 8>}, {transform_indices = @transform_8, window_bounds = array<i64: 1, 32, 16>}]} {
    %c0 = arith.constant 0 : index
    %c0_0 = arith.constant 0 : index
    %c0_1 = arith.constant 0 : index
    %0 = vector.load %arg1[%c0, %c0_0, %c0_1] : memref<1x4x16xf32, #tpu.memory_space<vmem>>, vector<1x4x16xf32>
    %1 = vector.shape_cast %0 : vector<1x4x16xf32> to vector<4x16xf32>
    %c0_2 = arith.constant 0 : index
    %c0_3 = arith.constant 0 : index
    %c0_4 = arith.constant 0 : index
    %2 = vector.load %arg2[%c0_2, %c0_3, %c0_4] : memref<2x4x1xf32, #tpu.memory_space<vmem>>, vector<2x4x1xf32>
    %c0_5 = arith.constant 0 : index
    %c0_6 = arith.constant 0 : index
    %c0_7 = arith.constant 0 : index
    %3 = vector.load %arg3[%c0_5, %c0_6, %c0_7] : memref<2x4x1xf32, #tpu.memory_space<vmem>>, vector<2x4x1xf32>
    %cst = arith.constant dense<0.000000e+00> : vector<4x1xf32>
    %4 = vector.multi_reduction <add>, %2, %cst [0] : vector<2x4x1xf32> to vector<4x1xf32>
    %cst_8 = arith.constant 3.125000e-02 : f32
    %5 = vector.broadcast %cst_8 : f32 to vector<4x1xf32>
    %6 = arith.mulf %4, %5 : vector<4x1xf32>
    %cst_9 = arith.constant dense<0.000000e+00> : vector<4x1xf32>
    %7 = vector.multi_reduction <add>, %3, %cst_9 [0] : vector<2x4x1xf32> to vector<4x1xf32>
    %cst_10 = arith.constant 3.125000e-02 : f32
    %8 = vector.broadcast %cst_10 : f32 to vector<4x1xf32>
    %9 = arith.mulf %7, %8 : vector<4x1xf32>
    %10 = arith.mulf %6, %6 : vector<4x1xf32>
    %11 = arith.subf %9, %10 : vector<4x1xf32>
    %cst_11 = arith.constant 0.000000e+00 : f32
    %12 = vector.broadcast %cst_11 : f32 to vector<4x1xf32>
    %13 = arith.maximumf %11, %12 : vector<4x1xf32>
    %c0_12 = arith.constant 0 : index
    %c0_13 = arith.constant 0 : index
    %14 = vector.load %arg4[%c0_12, %c0_13] : memref<4x1xf32, #tpu.memory_space<vmem>>, vector<4x1xf32>
    %cst_14 = arith.constant 9.99999974E-6 : f32
    %15 = vector.broadcast %cst_14 : f32 to vector<4x1xf32>
    %16 = arith.addf %13, %15 : vector<4x1xf32>
    %17 = math.rsqrt %16 : vector<4x1xf32>
    %18 = arith.mulf %14, %17 : vector<4x1xf32>
    %c0_15 = arith.constant 0 : index
    %c0_16 = arith.constant 0 : index
    %19 = vector.load %arg5[%c0_15, %c0_16] : memref<4x1xf32, #tpu.memory_space<vmem>>, vector<4x1xf32>
    %20 = arith.mulf %18, %6 : vector<4x1xf32>
    %21 = arith.subf %19, %20 : vector<4x1xf32>
    %22 = vector.broadcast %18 : vector<4x1xf32> to vector<4x16xf32>
    %23 = arith.mulf %1, %22 : vector<4x16xf32>
    %24 = vector.broadcast %21 : vector<4x1xf32> to vector<4x16xf32>
    %25 = arith.addf %23, %24 : vector<4x16xf32>
    %cst_17 = arith.constant 0.000000e+00 : f32
    %26 = vector.broadcast %cst_17 : f32 to vector<4x16xf32>
    %27 = arith.maximumf %25, %26 : vector<4x16xf32>
    %c0_18 = arith.constant 0 : index
    %c0_19 = arith.constant 0 : index
    %28 = vector.load %arg6[%c0_18, %c0_19] : memref<8x4xf32, #tpu.memory_space<vmem>>, vector<8x4xf32>
    %cst_20 = arith.constant dense<0.000000e+00> : vector<8x16xf32>
    %29 = tpu.matmul %28, %27, %cst_20 {dimension_numbers = #tpu.dot_dimension_numbers<[1], [0], [0], [1], [0, 0, 1, 1], [], []>} : vector<8x4xf32>, vector<4x16xf32>, vector<8x16xf32> -> vector<8x16xf32>
    %c0_21 = arith.constant 0 : index
    %c0_22 = arith.constant 0 : index
    %30 = vector.load %arg7[%c0_21, %c0_22] : memref<8x1xf32, #tpu.memory_space<vmem>>, vector<8x1xf32>
    %31 = vector.broadcast %30 : vector<8x1xf32> to vector<8x16xf32>
    %32 = arith.addf %29, %31 : vector<8x16xf32>
    %cst_23 = arith.constant dense<0xFF800000> : vector<16xf32>
    %33 = vector.multi_reduction <maximumf>, %32, %cst_23 [0] : vector<8x16xf32> to vector<16xf32>
    %34 = vector.shape_cast %33 : vector<16xf32> to vector<1x16xf32>
    %35 = vector.broadcast %34 : vector<1x16xf32> to vector<8x16xf32>
    %36 = arith.subf %32, %35 : vector<8x16xf32>
    %37 = math.exp %36 : vector<8x16xf32>
    %cst_24 = arith.constant dense<0.000000e+00> : vector<16xf32>
    %38 = vector.multi_reduction <add>, %37, %cst_24 [0] : vector<8x16xf32> to vector<16xf32>
    %39 = vector.shape_cast %38 : vector<16xf32> to vector<1x16xf32>
    %40 = vector.broadcast %39 : vector<1x16xf32> to vector<8x16xf32>
    %41 = arith.divf %37, %40 : vector<8x16xf32>
    %c0_25 = arith.constant 0 : index
    %c0_26 = arith.constant 0 : index
    %c0_27 = arith.constant 0 : index
    %42 = vector.load %arg8[%c0_25, %c0_26, %c0_27] : memref<1x32x8xf32, #tpu.memory_space<vmem>>, vector<1x32x8xf32>
    %43 = vector.shape_cast %42 : vector<1x32x8xf32> to vector<32x8xf32>
    %cst_28 = arith.constant dense<0.000000e+00> : vector<32x16xf32>
    %44 = tpu.matmul %43, %41, %cst_28 {dimension_numbers = #tpu.dot_dimension_numbers<[1], [0], [0], [1], [0, 0, 1, 1], [], []>} : vector<32x8xf32>, vector<8x16xf32>, vector<32x16xf32> -> vector<32x16xf32>
    %c0_29 = arith.constant 0 : index
    %c0_30 = arith.constant 0 : index
    %c0_31 = arith.constant 0 : index
    %45 = vector.load %arg9[%c0_29, %c0_30, %c0_31] : memref<1x32x16xf32, #tpu.memory_space<vmem>>, vector<1x32x16xf32>
    %46 = vector.shape_cast %45 : vector<1x32x16xf32> to vector<32x16xf32>
    %47 = vector.shape_cast %44 : vector<32x16xf32> to vector<1x32x16xf32>
    tpu.vector_store %arg9[%c0_29, %c0_30, %c0_31], %47 {strides = array<i32>} : memref<1x32x16xf32, #tpu.memory_space<vmem>>, vector<1x32x16xf32>,
    return
  }
  func.func @transform_0(%arg0: i32) -> (i32, i32, i32) {
    %c0_i32 = arith.constant 0 : i32
    %c0_i32_0 = arith.constant 0 : i32
    %c0_i32_1 = arith.constant 0 : i32
    return %arg0, %c0_i32, %c0_i32_0 : i32, i32, i32
  }
  func.func @transform_1(%arg0: i32) -> (i32, i32, i32) {
    %c0_i32 = arith.constant 0 : i32
    %c0_i32_0 = arith.constant 0 : i32
    %c0_i32_1 = arith.constant 0 : i32
    %c0_i32_2 = arith.constant 0 : i32
    return %c0_i32, %c0_i32_0, %c0_i32_1 : i32, i32, i32
  }
  func.func @transform_2(%arg0: i32) -> (i32, i32, i32) {
    %c0_i32 = arith.constant 0 : i32
    %c0_i32_0 = arith.constant 0 : i32
    %c0_i32_1 = arith.constant 0 : i32
    %c0_i32_2 = arith.constant 0 : i32
    return %c0_i32, %c0_i32_0, %c0_i32_1 : i32, i32, i32
  }
  func.func @transform_3(%arg0: i32) -> (i32, i32) {
    %c0_i32 = arith.constant 0 : i32
    %c0_i32_0 = arith.constant 0 : i32
    %c0_i32_1 = arith.constant 0 : i32
    return %c0_i32, %c0_i32_0 : i32, i32
  }
  func.func @transform_4(%arg0: i32) -> (i32, i32) {
    %c0_i32 = arith.constant 0 : i32
    %c0_i32_0 = arith.constant 0 : i32
    %c0_i32_1 = arith.constant 0 : i32
    return %c0_i32, %c0_i32_0 : i32, i32
  }
  func.func @transform_5(%arg0: i32) -> (i32, i32) {
    %c0_i32 = arith.constant 0 : i32
    %c0_i32_0 = arith.constant 0 : i32
    %c0_i32_1 = arith.constant 0 : i32
    return %c0_i32, %c0_i32_0 : i32, i32
  }
  func.func @transform_6(%arg0: i32) -> (i32, i32) {
    %c0_i32 = arith.constant 0 : i32
    %c0_i32_0 = arith.constant 0 : i32
    %c0_i32_1 = arith.constant 0 : i32
    return %c0_i32, %c0_i32_0 : i32, i32
  }
  func.func @transform_7(%arg0: i32) -> (i32, i32, i32) {
    %c0_i32 = arith.constant 0 : i32
    %c0_i32_0 = arith.constant 0 : i32
    %c0_i32_1 = arith.constant 0 : i32
    return %arg0, %c0_i32, %c0_i32_0 : i32, i32, i32
  }
  func.func @transform_8(%arg0: i32) -> (i32, i32, i32) {
    %c0_i32 = arith.constant 0 : i32
    %c0_i32_0 = arith.constant 0 : i32
    %c0_i32_1 = arith.constant 0 : i32
    return %arg0, %c0_i32, %c0_i32_0 : i32, i32, i32
  }
}

</mosaic_0001>

<bundles_post_ra>
// kernel: diff_unpool_forward.2
= control target key start
LH: loop header
LB: loop body
LE: loop exit
PB: predicated region body
PF: predicated region fallthrough
CT: control target
= control target key end

     0   :  { %s377_s12 = smov 0   ;;  %s411_s0 = inlined_call_operand.vmem [shape: f32[2,4,16], index: 0, kind: input, shape index: {}]   ;;  %s412_s1 = inlined_call_operand.vmem [shape: f32[2,4,16], index: 1, kind: output, shape index: {0}]   ;;  %s413_s2 = inlined_call_operand.vmem [shape: f32[2,4,1], index: 2, kind: output, shape index: {1}]   ;;  %s414_s3 = inlined_call_operand.vmem [shape: f32[2,4,1], index: 3, kind: output, shape index: {2}]  }
   0x1 LB: > { %s328_s13 = sadd.s32 4294967295, %s355_s12   ;;  %p332_p0 = scmp.ge.s32.totalorder %s355_s12, 1  ;;  %s355_s12 = sphi %s377_s12, %s14_s12  }
   0x2   : > { %p141_p1 = scmp.lt.s32.totalorder %s355_s12, 3 }
   0x4   : > { %p142_p2 = pnand %p332_p0, %p141_p1 }
   0x5   : > { %p171_p3 = scmp.lt.s32.totalorder (!%p142_p2), %s328_s13, 1 }
   0x6   : > { %145 = sbr.rel (%p142_p2) target bundleno = 463 (0x1cf), region = 24 }
   0xb   : > { %s416_s13 = smov (!%p171_p3, %s328_s13), 1  ;;  %vm188_vm0 = vcmask 125952   ;;  %vm206_vm1 = vcmask 3072  }
   0xc   : > { %s385_s14 = sshll.u32 %s416_s13, 2 }
   0xd   : > { %s174_s17 = scalar_lea.vmem %s411_s0, %s385_s14  ;;  %s178_s20 = scalar_lea.vmem %s412_s1, %s385_s14 }
   0xe   : > { %v187_v0 = vld [vmem:[%s174_s17] sm:$0xf]  ;;  %s182_s23 = scalar_lea.vmem %s413_s2, %s385_s14  ;;  %s186_s26 = scalar_lea.vmem %s414_s3, %s385_s14 }
   0xf   : > { %v189_v1 = vsel %vm188_vm0, %v187_v0, 0.0 }
  0x10   : > { %190 = vadd.xlane.f32.xlu0 %v189_v1 }
  0x99   : > { %v191_v2 = vpop.xlane.xlu0 %190 }
  0x9a   : > { %v192_v3 = vmul.f32 0.0625, %v191_v2 }
  0x9c   : > { %v193_v4 = vsub.f32 %v187_v0, %v192_v3 }
  0x9e   : > { %v194_v5 = vmul.f32 %v193_v4, %v193_v4 }
  0xa0   : > { %v195_v6 = vsel %vm188_vm0, %v194_v5, 0.0 }
  0xa1   : > { %196 = vadd.xlane.f32.xlu0 %v195_v6 }
 0x12a   : > { %v197_v7 = vpop.xlane.xlu0 %196 }
 0x12b   : > { %v198_v8 = vmul.f32 0.0625, %v197_v7 }
 0x12d   : > { %v199_v9 = vadd.f32 0.001, %v198_v8 }
 0x12f   : > { %347 = vrsqrt.f32 %v199_v9 }
 0x13c   : > { %v348_v10 = vpop.eup %347 }
 0x13d   : > { %v201_v11 = vmul.f32 %v348_v10, %v193_v4 }
 0x13f   : > { %v203_v12 = vsel %vm188_vm0, %v201_v11, 0.0  ;;  %202 = vst.msk [vmem:[%s178_s20] sm:$0xf] %vm188_vm0, %v201_v11  ;;  %v208_v13 = vmul.f32 %v201_v11, %v201_v11 }
 0x140   : > { %204 = vadd.xlane.f32.xlu1 %v203_v12 }
 0x141   : > { %v209_v14 = vsel %vm188_vm0, %v208_v13, 0.0 }
 0x144   : > { %210 = vadd.xlane.f32.xlu1 %v209_v14 }
 0x1c9   : > { %v205_v15 = vpop.xlane.xlu1 %204 }
 0x1ca   : > { %207 = vst.msk [vmem:[%s182_s23] sm:$0xf] %vm206_vm1, %v205_v15 }
 0x1cd   : > { %v211_v16 = vpop.xlane.xlu1 %210 }
 0x1ce   : > { %212 = vst.msk [vmem:[%s186_s26] sm:$0xf] %vm206_vm1, %v211_v16 }
 0x1cf PF: > { %s14_s12 = sadd.s32 1, %s355_s12  }
 0x1d0   : > { %p11_p4 = scmp.ge.s32.totalorder %s14_s12, 4  }
 0x1d2   :  { %13 = sbr.rel (!%p11_p4) target bundleno = 1 (0x1), region = 78 }

// kernel: diff_unpool_forward.3
= control target key start
LH: loop header
LB: loop body
LE: loop exit
PB: predicated region body
PF: predicated region fallthrough
CT: control target
= control target key end

     0   :  { %s753_s27 = smov 0   ;;  %s825_s0 = inlined_call_operand.vmem [shape: f32[2,4,16], index: 0, kind: input, shape index: {}]   ;;  %s826_s1 = inlined_call_operand.vmem [shape: f32[2,4,1], index: 1, kind: input, shape index: {}]   ;;  %s827_s2 = inlined_call_operand.vmem [shape: f32[2,4,1], index: 2, kind: input, shape index: {}]   ;;  %s828_s3 = inlined_call_operand.vmem [shape: f32[4,1], index: 3, kind: input, shape index: {}]   ;;  %s829_s4 = inlined_call_operand.vmem [shape: f32[4,1], index: 4, kind: input, shape index: {}]   ;;  %s830_s5 = inlined_call_operand.vmem [shape: f32[8,4], index: 5, kind: input, shape index: {}]   ;;  %s831_s6 = inlined_call_operand.vmem [shape: f32[8,1], index: 6, kind: input, shape index: {}]   ;;  %s832_s7 = inlined_call_operand.vmem [shape: f32[2,32,8], index: 7, kind: input, shape index: {}]   ;;  %s833_s8 = inlined_call_operand.vmem [shape: f32[2,32,16], index: 8, kind: output, shape index: {}]  }
   0x1 LB: > { %s638_s28 = sadd.s32 4294967295, %s703_s27   ;;  %p642_p0 = scmp.ge.s32.totalorder %s703_s27, 1  ;;  %s703_s27 = sphi %s753_s27, %s18_s27  }
   0x2   : > { %p271_p1 = scmp.lt.s32.totalorder %s703_s27, 3 }
   0x4   : > { %p272_p2 = pnand %p642_p0, %p271_p1 }
   0x5   : > { %p309_p3 = scmp.lt.s32.totalorder (!%p272_p2), %s638_s28, 1 }
   0x6   : > { %275 = sbr.rel (%p272_p2) target bundleno = 631 (0x277), region = 52 }
   0xb   : > { %v324_v0 = vld [vmem:[%s826_s1] sm:$0xf]  ;;  %v325_v1 = vld [vmem:[%s826_s1 + $0x4] sm:$0xf]  ;;  %vm328_vm0 = vcmask 3072   ;;  %v705_v2 = vmov 0  }
   0xc   : > { %689 = vset.pattern.permute.xlu0 %v705_v2  ;;  %v326_v3 = vld [vmem:[%s827_s2] sm:$0xf]  ;;  %v327_v4 = vld [vmem:[%s827_s2 + $0x4] sm:$0xf]  ;;  %v329_v5 = vsel %vm328_vm0, %v324_v0, 0.0  ;;  %v330_v6 = vsel %vm328_vm0, %v325_v1, 0.0  ;;  %690 = vset.pattern.permute.xlu1 %v705_v2 }
   0xd   : > { %v331_v7 = vadd.f32 %v330_v6, %v329_v5  ;;  %v333_v8 = vsel %vm328_vm0, %v326_v3, 0.0  ;;  %v334_v9 = vsel %vm328_vm0, %v327_v4, 0.0  ;;  %v340_v17 = vld [vmem:[%s828_s3] sm:$0xf]  ;;  %v706_v23 = vmov 0.0   ;;  %s835_s28 = smov (!%p309_p3, %s638_s28), 1 }
   0xe   : > { %v335_v10 = vadd.f32 %v334_v9, %v333_v8  ;;  %v344_v20 = vld [vmem:[%s829_s4] sm:$0xf]  ;;  %665 = vmatprep.subr.mxu0 %v706_v23  ;;  %vm707_vm1 = vmmov 0   ;;  %s643_s21 = sshll.u32 %s835_s28, 2  ;;  %vm371_vm2 = vcmask 1043456   ;;  %vm367_vm3 = vcmask 31744  }
   0xf   : > { %v332_v11 = vmul.f32 0.03125, %v331_v7  ;;  %667 = vmatprep.mubr.msk.f32.mxu0 %vm707_vm1, %v706_v23  ;;  %v361_v24 = vld [vmem:[%s831_s6] sm:$0xff]  ;;  %s312_s24 = scalar_lea.vmem %s825_s0, %s643_s21  ;;  %s656_s29 = sshll.u32 %s835_s28, 5  ;;  %vm469_vm4 = vcmask 64512   ;;  %vm445_vm5 = vcmask 130048  }
  0x10   : > { %v336_v12 = vmul.f32 0.03125, %v335_v10  ;;  %364 = vperm.xlu1 %690, %v361_v24   ;;  %v323_v26 = vld [vmem:[%s312_s24] sm:$0xf]  ;;  %s801_s10 = scalar_lea.vmem %s832_s7, %s656_s29  ;;  %s322_s13 = scalar_lea.vmem %s833_s8, %s656_s29 }
  0x11   : > { %v337_v13 = vmul.f32 %v332_v11, %v332_v11  ;;  %v360_v31 = vld [vmem:[%s830_s5] sm:$0xff]  ;;  %v466_v56 = vld [vmem:[%s801_s10 + $0x8] sm:$0xff]  ;;  %v467_v57 = vld [vmem:[%s801_s10 + $0x10] sm:$0xff] }
  0x12   : > { %v465_v32 = vld [vmem:[%s801_s10] sm:$0xff]  ;;  %v468_v58 = vld [vmem:[%s801_s10 + $0x18] sm:$0xff] }
  0x13   : > { %v338_v14 = vsub.f32 %v336_v12, %v337_v13  ;;  %672 = vmatprep.mubr.msk.f32.mxu1 %vm469_vm4, %v465_v32 }
  0x15   : > { %v339_v15 = vmax.f32 %v338_v14, 0.0 }
  0x17   : > { %v341_v16 = vadd.f32 1e-05, %v339_v15 }
  0x19   : > { %691 = vrsqrt.f32 %v341_v16 }
  0x26   : > { %v692_v18 = vpop.eup %691 }
  0x27   : > { %v343_v19 = vmul.f32 %v692_v18, %v340_v17 }
  0x29   : > { %349 = vperm.xlu0 %689, %v343_v19   ;;  %v345_v21 = vmul.f32 %v343_v19, %v332_v11 }
  0x2b   : > { %v346_v22 = vsub.f32 %v344_v20, %v345_v21 }
  0x2d   : > { %355 = vperm.xlu0 %689, %v346_v22  }
  0x8b   : > { %v365_v33 = vpop.permute.xlu1 %364 }
  0xa4   : > { %v350_v25 = vpop.permute.xlu0 %349 }
  0xa5   : > { %v352_v27 = vmul.f32 %v350_v25, %v323_v26 }
  0xa8   : > { %v356_v28 = vpop.permute.xlu0 %355 }
  0xa9   : > { %v358_v29 = vadd.f32 %v356_v28, %v352_v27 }
  0xab   : > { %v359_v30 = vmax.f32 %v358_v29, 0.0 }
  0xad   : > { %666 = vmatpush3.msk.msra.mxu0 %vm371_vm2, %v359_v30 }
  0xae   : > { %668 = vmatmul.mubr.msk.f32.vlgmr.msra.gmra.mxu0 %vm367_vm3, %v360_v31 }
 0x16e   : > { %v441_v34 = vpop.f32.mrf.mxu0 }
 0x16f   : > { %v442_v35 = vadd.f32 %v441_v34, %v365_v33 }
 0x170   : > { %v669_v36 = vpop.f32.mrf.mxu0 }
 0x171   : > { %v446_v37 = vsel %vm445_vm5, %v442_v35, -inf }
 0x172   : > { %v447_v38 = vrot.slane %v446_v37, 4 }
 0x174   : > { %v448_v39 = vmax.f32 %v446_v37, %v447_v38 }
 0x176   : > { %v449_v40 = vrot.slane %v448_v39, 2 }
 0x178   : > { %v450_v41 = vmax.f32 %v448_v39, %v449_v40 }
 0x17a   : > { %v451_v42 = vrot.slane %v450_v41, 1 }
 0x17c   : > { %v452_v43 = vmax.f32 %v450_v41, %v451_v42 }
 0x17e   : > { %v453_v44 = vsub.f32 %v442_v35, %v452_v43 }
 0x180   : > { %v454_v45 = vmul.f32 1.442695, %v453_v44 }
 0x182   : > { %693 = vpow2.f32 %v454_v45 }
 0x18f   : > { %v694_v46 = vpop.eup %693 }
 0x190   : > { %v456_v47 = vsel %vm445_vm5, %v694_v46, 0.0 }
 0x191   : > { %v457_v48 = vrot.slane %v456_v47, 4 }
 0x193   : > { %v458_v49 = vadd.f32 %v457_v48, %v456_v47 }
 0x195   : > { %v459_v50 = vrot.slane %v458_v49, 2 }
 0x197   : > { %v460_v51 = vadd.f32 %v459_v50, %v458_v49 }
 0x199   : > { %v461_v52 = vrot.slane %v460_v51, 1 }
 0x19b   : > { %v462_v53 = vadd.f32 %v461_v52, %v460_v51 }
 0x19d   : > { %695 = vrcp.f32 %v462_v53 }
 0x1aa   : > { %v696_v54 = vpop.eup %695 }
 0x1ab   : > { %v464_v55 = vmul.f32 %v696_v54, %v694_v46 }
 0x1ad   : > { %670 = vmatprep.subr.mxu1 %v464_v55 }
 0x1ae   : > { %671 = vmatpush3.msra.mxu1 %v464_v55 }
 0x1af   : > { %673 = vmatmul.mubr.msk.f32.vlgmr.msra.gmra.mxu1 %vm469_vm4, %v466_v56 }
 0x1b0   : > { %675 = vmatprep.mubr.msk.f32.mxu1 %vm469_vm4, %v467_v57 }
 0x1b3   : > { %676 = vmatmul.mubr.msk.f32.gmra.mxu1 %vm469_vm4, %v468_v58 }
 0x26f   : > { %v674_v59 = vpop.f32.mrf.mxu1 }
 0x270   : > { %568 = vst.msk [vmem:[%s322_s13 + $0x8] sm:$0xff] %vm445_vm5, %v674_v59 }
 0x271   : > { %v548_v60 = vpop.f32.mrf.mxu1 }
 0x272   : > { %567 = vst.msk [vmem:[%s322_s13] sm:$0xff] %vm445_vm5, %v548_v60 }
 0x273   : > { %v677_v61 = vpop.f32.mrf.mxu1 }
 0x274   : > { %570 = vst.msk [vmem:[%s322_s13 + $0x18] sm:$0xff] %vm445_vm5, %v677_v61 }
 0x275   : > { %v558_v62 = vpop.f32.mrf.mxu1 }
 0x276   : > { %569 = vst.msk [vmem:[%s322_s13 + $0x10] sm:$0xff] %vm445_vm5, %v558_v62 }
 0x277 PF: > { %s18_s27 = sadd.s32 1, %s703_s27  }
 0x278   : > { %p15_p4 = scmp.ge.s32.totalorder %s18_s27, 4  }
 0x27a   :  { %17 = sbr.rel (!%p15_p4) target bundleno = 1 (0x1), region = 85 }

</bundles_post_ra>
